<compile_context>
chip_gen: v7x
topology: tpu7x:2x2x1
jax: 0.10.0
libtpu: 0.0.40
codegen_flags: <defaults>
</compile_context>

<pallas_src>
import jax
import jax.numpy as jnp
from jax.experimental import pallas as pl
from jax.experimental.pallas import tpu as pltpu


def empty_forward(graph, node_feature):
    """Pallas-free fast path == Empty.forward: return node_feature unchanged.

    Launching a kernel for an identity op is pure wasted HBM bandwidth, so the
    default implementation simply returns the input (zero bytes moved).
    """
    del graph  # unused, exactly like the reference module
    return node_feature


def _hbm_copy_kernel(x_hbm_ref, o_hbm_ref, sem):
    # Single HBM -> HBM DMA of the full array.  No VMEM staging, no vregs,
    # no per-tile grid-step overhead: the DMA engine streams the bytes at
    # HBM bandwidth while the TensorCore does nothing.
    cp = pltpu.make_async_copy(x_hbm_ref, o_hbm_ref, sem)
    cp.start()
    cp.wait()


def empty_forward_pallas(graph, node_feature):
    """Optional kernelized identity: materialized copy via a direct HBM->HBM DMA."""
    del graph  # unused, exactly like the reference module
    x = node_feature
    nbytes = x.size * jnp.dtype(x.dtype).itemsize
    cost = pl.CostEstimate(
        flops=0, transcendentals=0, bytes_accessed=2 * nbytes
    )
    return pl.pallas_call(
        _hbm_copy_kernel,
        out_shape=jax.ShapeDtypeStruct(x.shape, x.dtype),
        # Leave both operands in HBM; the kernel moves the bytes itself.
        in_specs=[pl.BlockSpec(memory_space=pl.ANY)],
        out_specs=pl.BlockSpec(memory_space=pl.ANY),
        scratch_shapes=[pltpu.SemaphoreType.DMA],
        cost_estimate=cost,
    )(x)


if __name__ == "__main__":
    key = jax.random.PRNGKey(0)

    num_nodes = 8
    in_feats = 32  # == Empty(in_feats).output_dim; no parameters to initialize

    node_feature = jax.random.normal(key, (num_nodes, in_feats), dtype=jnp.float32)
    graph = None  # the module ignores the graph argument entirely

    # Default (recommended) path: no kernel, pure identity.
    out_fast = empty_forward(graph, node_feature)
    out_fast = jax.block_until_ready(out_fast)

    # Kernelized path: distinct materialized copy via one HBM->HBM DMA.
    out_kernel = empty_forward_pallas(graph, node_feature)
    out_kernel = jax.block_until_ready(out_kernel)

    # Semantics check: both outputs must exactly equal the input.
    for out in (out_fast, out_kernel):
        assert out.shape == node_feature.shape
        assert out.dtype == node_feature.dtype
        assert bool(jnp.all(out == node_feature))

    print("KERNEL_OK")
</pallas_src>

<mosaic_0001>
module attributes {stable_mosaic.version = 11 : i64} {
  func.func @_hbm_copy_kernel(%arg0: memref<8x32xf32, #tpu.memory_space<any>>, %arg1: memref<8x32xf32, #tpu.memory_space<any>>, %arg2: memref<!tpu.dma_semaphore, #tpu.memory_space<semaphore_mem>>) attributes {dimension_semantics = [], scalar_prefetch = 0 : i64, scratch_operands = 1 : i64, tpu.core_type = #tpu.core_type<tc>} {
    tpu.enqueue_dma source(%arg0 : memref<8x32xf32, #tpu.memory_space<any>>) target(%arg1 : memref<8x32xf32, #tpu.memory_space<any>>) target_semaphore(%arg2 : memref<!tpu.dma_semaphore, #tpu.memory_space<semaphore_mem>>)
    tpu.wait_dma2 semaphore(%arg2 : memref<!tpu.dma_semaphore, #tpu.memory_space<semaphore_mem>>) src(%arg0 : memref<8x32xf32, #tpu.memory_space<any>>) dst(%arg1 : memref<8x32xf32, #tpu.memory_space<any>>)
    return
  }
}

</mosaic_0001>

<bundles_post_ra>
// kernel: tpu_custom_call.1
= control target key start
LH: loop header
LB: loop body
LE: loop exit
PB: predicated region body
PF: predicated region fallthrough
CT: control target
= control target key end

     0   :  { %s34_s6 = smov [#allocation2]   ;;  %s35_s7 = smov [#allocation3]   ;;  %s53_s0 = inlined_call_operand.hbm [shape: f32[8,32], index: 0, kind: input, shape index: {}]   ;;  %s54_s1 = inlined_call_operand.hbm [shape: f32[8,32], index: 1, kind: output, shape index: {}]  }
   0x1   :  { %s36_s8 = smov 0  }
   0x2   :  { %18 = dma.general %s53_s0, 128, %s54_s1, %s34_s6, %s35_s7, [#allocation4], %s36_s8, 0  }
   0x3   :  { %32 = dma.done.wait [#allocation2], 128 }
   0x4   :  { %33 = vsyncadd [#allocation2], 4294967168 }
   0x5   :  { %22 = vsyncmov [#allocation2] }
   0x8   :  { %s23_s13 = vpop.sfrf %22 }
   0x9   :  { %p28_p0 = scmp.ne.s32.totalorder %s23_s13, 0 }
   0xb   :  { %27 = shalt.err (%p28_p0)  }

</bundles_post_ra>
